<compile_context>
chip_gen: v7x
topology: tpu7x:2x2x1
jax: 0.10.0
libtpu: 0.0.40
codegen_flags: <defaults>
</compile_context>

<pallas_src>
import functools
import numpy as np
import jax
import jax.numpy as jnp
from jax.experimental import pallas as pl
from jax.experimental.pallas import tpu as pltpu

NF = 64            # nf (module default)
GC = 32            # gc (module default)
TILE_P_MAX = 8192  # max pixel-lanes per grid step (multiple of 128)


def _layer_dims(nf, gc):
    in_chs = (nf, nf + gc, nf + 2 * gc, nf + 3 * gc, nf + 4 * gc)
    out_chs = (gc, gc, gc, gc, nf)
    return in_chs, out_chs


def _round_up(v, m):
    return ((v + m - 1) // m) * m


def _lrelu(v):
    # LeakyReLU(negative_slope=0.2); fp32.
    return jnp.where(v >= 0.0, v, 0.2 * v)


def rdb5c_kernel(x_ref, w_ref, b_ref, o_ref, act_ref, *, nf, gc, k_pad):
    """One ResidualDenseBlock_5C_1x1 on a channel-major (nf, TP) pixel tile.

    x_ref  : (nf, TP)           fp32 input tile (pixels on lanes)
    w_ref  : (4*gc+nf, k_pad)   bf16 packed weight slab, rows = [conv1..conv5] outputs,
                                contraction dim zero-padded to k_pad lanes
    b_ref  : (4*gc+nf, 1)       fp32 packed bias slab
    o_ref  : (nf, TP)           fp32 output tile
    act_ref: (k_pad, TP)        bf16 VMEM concat scratch holding [x, x1, x2, x3, x4, 0-pad]
    """
    _, out_chs = _layer_dims(nf, gc)
    tp = act_ref.shape[1]

    # Seed the concat scratch: rows [0, nf) = x, rows [nf, k_pad) = 0 so the
    # zero-padded weight columns of every layer contract against zeros (rows
    # [nf, nf+4*gc) are overwritten with x1..x4 as the block proceeds).
    act_ref[0:nf, :] = x_ref[...].astype(jnp.bfloat16)
    act_ref[nf:k_pad, :] = jnp.zeros((k_pad - nf, tp), jnp.bfloat16)

    row = 0       # row offset into packed weight/bias slabs
    col = nf      # next write offset in the concat scratch
    for layer in range(5):
        oc = out_chs[layer]
        w = w_ref[row:row + oc, :]                 # (oc, k_pad) bf16, full-lane static slice
        acc = jnp.dot(w, act_ref[...],             # bf16 x bf16 -> fp32 on MXU
                      preferred_element_type=jnp.float32)
        acc = acc + b_ref[row:row + oc, :]         # fp32 bias, lane-broadcast
        if layer < 4:
            act_ref[col:col + oc, :] = _lrelu(acc).astype(jnp.bfloat16)
            col += oc
        else:
            # x5 * 0.2 + x  (residual re-reads the still-resident fp32 input tile)
            o_ref[...] = (acc * 0.2 + x_ref[...]).astype(o_ref.dtype)
        row += oc


def init_params(key, nf, gc):
    """Deterministic synthetic params: 5 (weight, bias) pairs, weight = (out, in)."""
    in_chs, out_chs = _layer_dims(nf, gc)
    weights, biases = [], []
    for ic, oc in zip(in_chs, out_chs):
        key, kw, kb = jax.random.split(key, 3)
        w = jax.random.normal(kw, (oc, ic), jnp.float32) / np.sqrt(ic)
        b = 0.01 * jax.random.normal(kb, (oc,), jnp.float32)
        weights.append(w)
        biases.append(b)
    return weights, biases


def pack_params(weights, biases, nf, gc):
    """Pack 5 layers into one bf16 weight slab (K padded to 128-mult) + one fp32 bias slab."""
    in_chs, out_chs = _layer_dims(nf, gc)
    k_pad = _round_up(in_chs[-1], 128)             # nf + 4*gc = 192 -> 256
    rows = sum(out_chs)                            # 4*gc + nf = 192
    w_slab = np.zeros((rows, k_pad), np.float32)   # zero columns beyond each layer's true K
    b_slab = np.zeros((rows, 1), np.float32)
    row = 0
    for w, b, ic, oc in zip(weights, biases, in_chs, out_chs):
        w_slab[row:row + oc, :ic] = np.asarray(w)
        b_slab[row:row + oc, 0] = np.asarray(b)
        row += oc
    return jnp.asarray(w_slab, jnp.bfloat16), jnp.asarray(b_slab, jnp.float32)


def _choose_tile_p(n_batch, hw):
    """Pixel-lane tile: multiple of 128, <= TILE_P_MAX, and (if possible) enough
    grid steps (>= 4) that v7x's two TensorCores each get >= 2 pipelined steps."""
    if hw <= 128:
        return hw                                   # full extent (exempt from 128-lane rule)
    tp = min(TILE_P_MAX, pl.cdiv(hw, 128) * 128)
    while tp > 128 and n_batch * pl.cdiv(hw, tp) < 4:
        tp = max(128, (tp // 2 // 128) * 128)
    return tp


def rdb5c_pallas(x_nchw, w_slab, b_slab, nf=NF, gc=GC):
    N, C, H, W = x_nchw.shape
    assert C == nf
    HW = H * W
    k_pad = w_slab.shape[1]

    # Free view: NCHW -> (N, C, H*W).  No transpose, no jnp.pad: the pixel axis
    # is tiled directly; a ragged last tile is handled by Pallas block masking
    # (the op is pointwise along pixels, so padded lanes never contaminate
    # in-bounds lanes).
    x3d = x_nchw.reshape(N, C, HW)

    tp = _choose_tile_p(N, HW)
    grid = (N, pl.cdiv(HW, tp))

    # Explicit VMEM budget (v5e default scoped limit is 16 MiB; v7x physical is 64 MiB).
    io_bytes = 2 * 2 * (nf * tp * 4)                         # x + out tiles, double-buffered fp32
    scratch_bytes = k_pad * tp * 2                           # bf16 concat scratch
    wb_bytes = 2 * (int(w_slab.size) * 2 + b_slab.shape[0] * 128 * 4)
    vmem_bytes = int(min(max(io_bytes + scratch_bytes + wb_bytes + (8 << 20),
                             16 << 20), 64 << 20))

    kernel = functools.partial(rdb5c_kernel, nf=nf, gc=gc, k_pad=k_pad)

    out3d = pl.pallas_call(
        kernel,
        out_shape=jax.ShapeDtypeStruct((N, C, HW), x_nchw.dtype),
        grid_spec=pltpu.PrefetchScalarGridSpec(
            num_scalar_prefetch=0,
            grid=grid,
            in_specs=[
                pl.BlockSpec((pl.Squeezed(), nf, tp), lambda n, i: (n, 0, i)),  # x tile
                pl.BlockSpec(w_slab.shape, lambda n, i: (0, 0)),                # weight slab (resident)
                pl.BlockSpec(b_slab.shape, lambda n, i: (0, 0)),                # bias slab (resident)
            ],
            out_specs=pl.BlockSpec((pl.Squeezed(), nf, tp), lambda n, i: (n, 0, i)),
            scratch_shapes=[pltpu.VMEM((k_pad, tp), jnp.bfloat16)],
        ),
        compiler_params=pltpu.CompilerParams(
            dimension_semantics=("parallel", "parallel"),
            vmem_limit_bytes=vmem_bytes),
    )(x3d, w_slab, b_slab)

    return out3d.reshape(N, C, H, W)


def rdb5c_reference(x_nchw, weights, biases, nf=NF, gc=GC):
    """Pure-JAX reference with the same bf16-operand / fp32-accumulate math."""
    N, C, H, W = x_nchw.shape
    x = x_nchw.reshape(N, C, H * W).astype(jnp.float32)

    def conv(acts, w, b):
        a = jnp.concatenate(acts, axis=1).astype(jnp.bfloat16)          # (N, K, P)
        y = jnp.einsum('ok,nkp->nop', w.astype(jnp.bfloat16), a,
                       preferred_element_type=jnp.float32)
        return y + b[None, :, None]

    x1 = _lrelu(conv([x], weights[0], biases[0]))
    x2 = _lrelu(conv([x, x1], weights[1], biases[1]))
    x3 = _lrelu(conv([x, x1, x2], weights[2], biases[2]))
    x4 = _lrelu(conv([x, x1, x2, x3], weights[3], biases[3]))
    x5 = conv([x, x1, x2, x3, x4], weights[4], biases[4])
    out = x5 * 0.2 + x
    return out.reshape(N, C, H, W)


if __name__ == "__main__":
    key = jax.random.PRNGKey(0)
    key, kx = jax.random.split(key)

    # Small NCHW input consistent with the module defaults (nf=64):
    # batch=2, channels=64, spatial 16x16  ->  HW = 256, tile_p = 128, grid = (2, 2).
    x = jax.random.normal(kx, (2, NF, 16, 16), jnp.float32)
    weights, biases = init_params(key, NF, GC)
    w_slab, b_slab = pack_params(weights, biases, NF, GC)

    out = jax.block_until_ready(rdb5c_pallas(x, w_slab, b_slab))
    ref = jax.block_until_ready(rdb5c_reference(x, weights, biases))
    np.testing.assert_allclose(np.asarray(out), np.asarray(ref),
                               rtol=1e-3, atol=1e-3)
    print("KERNEL_OK")
</pallas_src>

<mosaic_0001>
module attributes {stable_mosaic.version = 11 : i64} {
  func.func @rdb5c_kernel(%arg0: i32, %arg1: i32, %arg2: memref<1x64x128xf32, #tpu.memory_space<vmem>>, %arg3: memref<192x256xbf16, #tpu.memory_space<vmem>>, %arg4: memref<192x1xf32, #tpu.memory_space<vmem>>, %arg5: memref<1x64x128xf32, #tpu.memory_space<vmem>>, %arg6: memref<256x128xbf16, #tpu.memory_space<vmem>>) attributes {dimension_semantics = [#tpu.dimension_semantics<parallel>, #tpu.dimension_semantics<parallel>], iteration_bounds = array<i64: 2, 2>, scalar_prefetch = 0 : i64, scratch_operands = 1 : i64, tpu.core_type = #tpu.core_type<tc>, window_params = [{transform_indices = @transform_0, window_bounds = array<i64: 1, 64, 128>}, {pipeline_mode = #tpu.pipeline_mode<synchronous>, transform_indices = @transform_1, window_bounds = array<i64: 192, 256>}, {pipeline_mode = #tpu.pipeline_mode<synchronous>, transform_indices = @transform_2, window_bounds = array<i64: 192, 1>}, {transform_indices = @transform_3, window_bounds = array<i64: 1, 64, 128>}]} {
    %c0 = arith.constant 0 : index
    %c0_0 = arith.constant 0 : index
    %c0_1 = arith.constant 0 : index
    %0 = vector.load %arg2[%c0, %c0_0, %c0_1] : memref<1x64x128xf32, #tpu.memory_space<vmem>>, vector<1x64x128xf32>
    %1 = vector.shape_cast %0 : vector<1x64x128xf32> to vector<64x128xf32>
    %2 = arith.truncf %1 : vector<64x128xf32> to vector<64x128xbf16>
    %c0_2 = arith.constant 0 : index
    %c0_3 = arith.constant 0 : index
    %3 = vector.load %arg6[%c0_2, %c0_3] : memref<256x128xbf16, #tpu.memory_space<vmem>>, vector<64x128xbf16>
    tpu.vector_store %arg6[%c0_2, %c0_3], %2 {strides = array<i32>} : memref<256x128xbf16, #tpu.memory_space<vmem>>, vector<64x128xbf16>,
    %cst = arith.constant 0.000000e+00 : bf16
    %4 = vector.broadcast %cst : bf16 to vector<192x128xbf16>
    %c64 = arith.constant 64 : index
    %c0_4 = arith.constant 0 : index
    %5 = vector.load %arg6[%c64, %c0_4] : memref<256x128xbf16, #tpu.memory_space<vmem>>, vector<192x128xbf16>
    tpu.vector_store %arg6[%c64, %c0_4], %4 {strides = array<i32>} : memref<256x128xbf16, #tpu.memory_space<vmem>>, vector<192x128xbf16>,
    %c0_5 = arith.constant 0 : index
    %c0_6 = arith.constant 0 : index
    %6 = vector.load %arg3[%c0_5, %c0_6] : memref<192x256xbf16, #tpu.memory_space<vmem>>, vector<32x256xbf16>
    %c0_7 = arith.constant 0 : index
    %c0_8 = arith.constant 0 : index
    %7 = vector.load %arg6[%c0_7, %c0_8] : memref<256x128xbf16, #tpu.memory_space<vmem>>, vector<256x128xbf16>
    %cst_9 = arith.constant dense<0.000000e+00> : vector<32x128xf32>
    %8 = tpu.matmul %6, %7, %cst_9 {dimension_numbers = #tpu.dot_dimension_numbers<[1], [0], [0], [1], [0, 0, 1, 1], [], []>} : vector<32x256xbf16>, vector<256x128xbf16>, vector<32x128xf32> -> vector<32x128xf32>
    %c0_10 = arith.constant 0 : index
    %c0_11 = arith.constant 0 : index
    %9 = vector.load %arg4[%c0_10, %c0_11] : memref<192x1xf32, #tpu.memory_space<vmem>>, vector<32x1xf32>
    %10 = vector.broadcast %9 : vector<32x1xf32> to vector<32x128xf32>
    %11 = arith.addf %8, %10 : vector<32x128xf32>
    %cst_12 = arith.constant 0.000000e+00 : f32
    %12 = vector.broadcast %cst_12 : f32 to vector<32x128xf32>
    %13 = arith.cmpf oge, %11, %12 : vector<32x128xf32>
    %cst_13 = arith.constant 2.000000e-01 : f32
    %14 = vector.broadcast %cst_13 : f32 to vector<32x128xf32>
    %15 = arith.mulf %14, %11 : vector<32x128xf32>
    %16 = arith.select %13, %11, %15 : vector<32x128xi1>, vector<32x128xf32>
    %17 = arith.truncf %16 : vector<32x128xf32> to vector<32x128xbf16>
    %c64_14 = arith.constant 64 : index
    %c0_15 = arith.constant 0 : index
    %18 = vector.load %arg6[%c64_14, %c0_15] : memref<256x128xbf16, #tpu.memory_space<vmem>>, vector<32x128xbf16>
    tpu.vector_store %arg6[%c64_14, %c0_15], %17 {strides = array<i32>} : memref<256x128xbf16, #tpu.memory_space<vmem>>, vector<32x128xbf16>,
    %c32 = arith.constant 32 : index
    %c0_16 = arith.constant 0 : index
    %19 = vector.load %arg3[%c32, %c0_16] : memref<192x256xbf16, #tpu.memory_space<vmem>>, vector<32x256xbf16>
    %c0_17 = arith.constant 0 : index
    %c0_18 = arith.constant 0 : index
    %20 = vector.load %arg6[%c0_17, %c0_18] : memref<256x128xbf16, #tpu.memory_space<vmem>>, vector<256x128xbf16>
    %cst_19 = arith.constant dense<0.000000e+00> : vector<32x128xf32>
    %21 = tpu.matmul %19, %20, %cst_19 {dimension_numbers = #tpu.dot_dimension_numbers<[1], [0], [0], [1], [0, 0, 1, 1], [], []>} : vector<32x256xbf16>, vector<256x128xbf16>, vector<32x128xf32> -> vector<32x128xf32>
    %c32_20 = arith.constant 32 : index
    %c0_21 = arith.constant 0 : index
    %22 = vector.load %arg4[%c32_20, %c0_21] : memref<192x1xf32, #tpu.memory_space<vmem>>, vector<32x1xf32>
    %23 = vector.broadcast %22 : vector<32x1xf32> to vector<32x128xf32>
    %24 = arith.addf %21, %23 : vector<32x128xf32>
    %cst_22 = arith.constant 0.000000e+00 : f32
    %25 = vector.broadcast %cst_22 : f32 to vector<32x128xf32>
    %26 = arith.cmpf oge, %24, %25 : vector<32x128xf32>
    %cst_23 = arith.constant 2.000000e-01 : f32
    %27 = vector.broadcast %cst_23 : f32 to vector<32x128xf32>
    %28 = arith.mulf %27, %24 : vector<32x128xf32>
    %29 = arith.select %26, %24, %28 : vector<32x128xi1>, vector<32x128xf32>
    %30 = arith.truncf %29 : vector<32x128xf32> to vector<32x128xbf16>
    %c96 = arith.constant 96 : index
    %c0_24 = arith.constant 0 : index
    %31 = vector.load %arg6[%c96, %c0_24] : memref<256x128xbf16, #tpu.memory_space<vmem>>, vector<32x128xbf16>
    tpu.vector_store %arg6[%c96, %c0_24], %30 {strides = array<i32>} : memref<256x128xbf16, #tpu.memory_space<vmem>>, vector<32x128xbf16>,
    %c64_25 = arith.constant 64 : index
    %c0_26 = arith.constant 0 : index
    %32 = vector.load %arg3[%c64_25, %c0_26] : memref<192x256xbf16, #tpu.memory_space<vmem>>, vector<32x256xbf16>
    %c0_27 = arith.constant 0 : index
    %c0_28 = arith.constant 0 : index
    %33 = vector.load %arg6[%c0_27, %c0_28] : memref<256x128xbf16, #tpu.memory_space<vmem>>, vector<256x128xbf16>
    %cst_29 = arith.constant dense<0.000000e+00> : vector<32x128xf32>
    %34 = tpu.matmul %32, %33, %cst_29 {dimension_numbers = #tpu.dot_dimension_numbers<[1], [0], [0], [1], [0, 0, 1, 1], [], []>} : vector<32x256xbf16>, vector<256x128xbf16>, vector<32x128xf32> -> vector<32x128xf32>
    %c64_30 = arith.constant 64 : index
    %c0_31 = arith.constant 0 : index
    %35 = vector.load %arg4[%c64_30, %c0_31] : memref<192x1xf32, #tpu.memory_space<vmem>>, vector<32x1xf32>
    %36 = vector.broadcast %35 : vector<32x1xf32> to vector<32x128xf32>
    %37 = arith.addf %34, %36 : vector<32x128xf32>
    %cst_32 = arith.constant 0.000000e+00 : f32
    %38 = vector.broadcast %cst_32 : f32 to vector<32x128xf32>
    %39 = arith.cmpf oge, %37, %38 : vector<32x128xf32>
    %cst_33 = arith.constant 2.000000e-01 : f32
    %40 = vector.broadcast %cst_33 : f32 to vector<32x128xf32>
    %41 = arith.mulf %40, %37 : vector<32x128xf32>
    %42 = arith.select %39, %37, %41 : vector<32x128xi1>, vector<32x128xf32>
    %43 = arith.truncf %42 : vector<32x128xf32> to vector<32x128xbf16>
    %c128 = arith.constant 128 : index
    %c0_34 = arith.constant 0 : index
    %44 = vector.load %arg6[%c128, %c0_34] : memref<256x128xbf16, #tpu.memory_space<vmem>>, vector<32x128xbf16>
    tpu.vector_store %arg6[%c128, %c0_34], %43 {strides = array<i32>} : memref<256x128xbf16, #tpu.memory_space<vmem>>, vector<32x128xbf16>,
    %c96_35 = arith.constant 96 : index
    %c0_36 = arith.constant 0 : index
    %45 = vector.load %arg3[%c96_35, %c0_36] : memref<192x256xbf16, #tpu.memory_space<vmem>>, vector<32x256xbf16>
    %c0_37 = arith.constant 0 : index
    %c0_38 = arith.constant 0 : index
    %46 = vector.load %arg6[%c0_37, %c0_38] : memref<256x128xbf16, #tpu.memory_space<vmem>>, vector<256x128xbf16>
    %cst_39 = arith.constant dense<0.000000e+00> : vector<32x128xf32>
    %47 = tpu.matmul %45, %46, %cst_39 {dimension_numbers = #tpu.dot_dimension_numbers<[1], [0], [0], [1], [0, 0, 1, 1], [], []>} : vector<32x256xbf16>, vector<256x128xbf16>, vector<32x128xf32> -> vector<32x128xf32>
    %c96_40 = arith.constant 96 : index
    %c0_41 = arith.constant 0 : index
    %48 = vector.load %arg4[%c96_40, %c0_41] : memref<192x1xf32, #tpu.memory_space<vmem>>, vector<32x1xf32>
    %49 = vector.broadcast %48 : vector<32x1xf32> to vector<32x128xf32>
    %50 = arith.addf %47, %49 : vector<32x128xf32>
    %cst_42 = arith.constant 0.000000e+00 : f32
    %51 = vector.broadcast %cst_42 : f32 to vector<32x128xf32>
    %52 = arith.cmpf oge, %50, %51 : vector<32x128xf32>
    %cst_43 = arith.constant 2.000000e-01 : f32
    %53 = vector.broadcast %cst_43 : f32 to vector<32x128xf32>
    %54 = arith.mulf %53, %50 : vector<32x128xf32>
    %55 = arith.select %52, %50, %54 : vector<32x128xi1>, vector<32x128xf32>
    %56 = arith.truncf %55 : vector<32x128xf32> to vector<32x128xbf16>
    %c160 = arith.constant 160 : index
    %c0_44 = arith.constant 0 : index
    %57 = vector.load %arg6[%c160, %c0_44] : memref<256x128xbf16, #tpu.memory_space<vmem>>, vector<32x128xbf16>
    tpu.vector_store %arg6[%c160, %c0_44], %56 {strides = array<i32>} : memref<256x128xbf16, #tpu.memory_space<vmem>>, vector<32x128xbf16>,
    %c128_45 = arith.constant 128 : index
    %c0_46 = arith.constant 0 : index
    %58 = vector.load %arg3[%c128_45, %c0_46] : memref<192x256xbf16, #tpu.memory_space<vmem>>, vector<64x256xbf16>
    %c0_47 = arith.constant 0 : index
    %c0_48 = arith.constant 0 : index
    %59 = vector.load %arg6[%c0_47, %c0_48] : memref<256x128xbf16, #tpu.memory_space<vmem>>, vector<256x128xbf16>
    %cst_49 = arith.constant dense<0.000000e+00> : vector<64x128xf32>
    %60 = tpu.matmul %58, %59, %cst_49 {dimension_numbers = #tpu.dot_dimension_numbers<[1], [0], [0], [1], [0, 0, 1, 1], [], []>} : vector<64x256xbf16>, vector<256x128xbf16>, vector<64x128xf32> -> vector<64x128xf32>
    %c128_50 = arith.constant 128 : index
    %c0_51 = arith.constant 0 : index
    %61 = vector.load %arg4[%c128_50, %c0_51] : memref<192x1xf32, #tpu.memory_space<vmem>>, vector<64x1xf32>
    %62 = vector.broadcast %61 : vector<64x1xf32> to vector<64x128xf32>
    %63 = arith.addf %60, %62 : vector<64x128xf32>
    %cst_52 = arith.constant 2.000000e-01 : f32
    %64 = vector.broadcast %cst_52 : f32 to vector<64x128xf32>
    %65 = arith.mulf %63, %64 : vector<64x128xf32>
    %c0_53 = arith.constant 0 : index
    %c0_54 = arith.constant 0 : index
    %c0_55 = arith.constant 0 : index
    %66 = vector.load %arg2[%c0_53, %c0_54, %c0_55] : memref<1x64x128xf32, #tpu.memory_space<vmem>>, vector<1x64x128xf32>
    %67 = vector.shape_cast %66 : vector<1x64x128xf32> to vector<64x128xf32>
    %68 = arith.addf %65, %67 : vector<64x128xf32>
    %c0_56 = arith.constant 0 : index
    %c0_57 = arith.constant 0 : index
    %c0_58 = arith.constant 0 : index
    %69 = vector.load %arg5[%c0_56, %c0_57, %c0_58] : memref<1x64x128xf32, #tpu.memory_space<vmem>>, vector<1x64x128xf32>
    %70 = vector.shape_cast %69 : vector<1x64x128xf32> to vector<64x128xf32>
    %71 = vector.shape_cast %68 : vector<64x128xf32> to vector<1x64x128xf32>
    tpu.vector_store %arg5[%c0_56, %c0_57, %c0_58], %71 {strides = array<i32>} : memref<1x64x128xf32, #tpu.memory_space<vmem>>, vector<1x64x128xf32>,
    return
  }
  func.func @transform_0(%arg0: i32, %arg1: i32) -> (i32, i32, i32) {
    %c0_i32 = arith.constant 0 : i32
    %c0_i32_0 = arith.constant 0 : i32
    return %arg0, %c0_i32, %arg1 : i32, i32, i32
  }
  func.func @transform_1(%arg0: i32, %arg1: i32) -> (i32, i32) {
    %c0_i32 = arith.constant 0 : i32
    %c0_i32_0 = arith.constant 0 : i32
    %c0_i32_1 = arith.constant 0 : i32
    return %c0_i32, %c0_i32_0 : i32, i32
  }
  func.func @transform_2(%arg0: i32, %arg1: i32) -> (i32, i32) {
    %c0_i32 = arith.constant 0 : i32
    %c0_i32_0 = arith.constant 0 : i32
    %c0_i32_1 = arith.constant 0 : i32
    return %c0_i32, %c0_i32_0 : i32, i32
  }
  func.func @transform_3(%arg0: i32, %arg1: i32) -> (i32, i32, i32) {
    %c0_i32 = arith.constant 0 : i32
    %c0_i32_0 = arith.constant 0 : i32
    return %arg0, %c0_i32, %arg1 : i32, i32, i32
  }
}

</mosaic_0001>

<bundles_post_ra>
// kernel: tpu_custom_call.1
= control target key start
LH: loop header
LB: loop body
LE: loop exit
PB: predicated region body
PF: predicated region fallthrough
CT: control target
= control target key end

     0   :  { %8 = vsyncpa [#allocation4], 0  ;;  %s1862_s0 = inlined_call_operand.hbm [shape: f32[2,64,256], index: 0, kind: input, shape index: {}]   ;;  %s1863_s1 = inlined_call_operand.vmem [shape: bf16[192,256], index: 1, kind: input, shape index: {}]   ;;  %s1864_s2 = inlined_call_operand.vmem [shape: f32[192,1], index: 2, kind: input, shape index: {}]   ;;  %s1865_s3 = inlined_call_operand.hbm [shape: f32[2,64,256], index: 3, kind: output, shape index: {}]  }
   0x1   :  { %10 = vsyncpa [#allocation4 + $0x1], 0 }
   0x2   :  { %11 = vsyncpa [#allocation5], 0 }
   0x3   :  { %13 = vsyncpa [#allocation5 + $0x1], 0  ;;  %s1384_s12 = smov 0   ;;  %s1386_s13 = smov 0  }
   0x4   :  { %s1388_s14 = smov 0   ;;  %s1390_s15 = smov 0  }
   0x5   :  { %s1392_s16 = smov 0   ;;  %s1394_s17 = smov 0  }
   0x6   :  { %s1396_s18 = smov 0   ;;  %s1398_s19 = smov 0  }
   0x7 LB: > { %s1063_s20 = sadd.s32 4294967295, %s1353_s19   ;;  %s1064_s21 = sadd.s32 4294967294, %s1353_s19   ;;  %s1353_s19 = sphi %s1398_s19, %s19_s19   ;;  %s1349_s18 = sphi %s1396_s18, %s1883_s18   ;;  %s1345_s17 = sphi %s1394_s17, %s1882_s17   ;;  %s1341_s16 = sphi %s1392_s16, %s1881_s16   ;;  %s1337_s15 = sphi %s1390_s15, %s1880_s15   ;;  %s1333_s14 = sphi %s1388_s14, %s1879_s14   ;;  %s1329_s13 = sphi %s1386_s13, %s1878_s13   ;;  %s1325_s12 = sphi %s1384_s12, %s1877_s12  }
   0x8   : > { %s28_s22 = sadd.s32 1, %s1345_s17  ;;  %s31_s23 = sadd.s32 1, %s1349_s18 }
   0x9   : > { %p29_p0 = scmp.ge.s32.totalorder %s28_s22, 2  ;;  %s40_s24 = sadd.s32 1, %s1333_s14 }
   0xa   : > { %p47_p1 = scmp.ne.s32.totalorder %s1333_s14, %s1329_s13  ;;  %p48_p2 = scmp.eq.s32.totalorder %s1353_s19, 0 }
   0xb   : > { %s1885_s22 = smov (%p29_p0, %s28_s22), 0  ;;  %s1887_s23 = smov (!%p29_p0, %s31_s23), %s1349_s18 }
   0xc   : > { %s36_s25 = ssub.s32 %s1345_s17, %s1885_s22  ;;  %p1437_p3 = por %p48_p2, %p47_p1 }
   0xd   : > { %p33_p4 = scmp.ge.s32.totalorder %s1887_s23, 2  ;;  %p53_p5 = scmp.ne.s32.totalorder %s1329_s13, %s1325_s12 }
   0xe   : > { %p54_p6 = scmp.eq.s32.totalorder %s1063_s20, 0  ;;  %p121_p7 = scmp.eq.s32.totalorder %s1063_s20, 3 }
   0xf   : > { %s1889_s23 = smov (%p33_p4, %s1887_s23), 0  ;;  %p127_p10 = scmp.eq.s32.totalorder %s1064_s21, 3 }
  0x10   : > { %1869 = sst [smem:[#allocation9_spill]] %s1889_s23  ;;  %p1445_p8 = por %p54_p6, %p53_p5 }
  0x11   : > { %p1449_p9 = por %p121_p7, %p47_p1  ;;  %s35_s29 = ssub.s32 %s1349_s18, %s1889_s23 }
  0x12   : > { %s37_s30 = sor.u32 %s36_s25, %s35_s29  ;;  %p1455_p12 = por %p127_p10, %p53_p5 }
  0x13   : > { %s1871_s28 = scalar_select %p1449_p9, 1, 0 }
  0x14   : > { %p38_p11 = scmp.eq.s32.totalorder %s37_s30, 0  ;;  %p1114_p13 = scmp.lt.s32.totalorder %s1353_s19, 4 }
  0x15   : > { %s1872_s4 = scalar_select %p1455_p12, 1, 0 }
  0x16   : > { %s153_s5 = sand.u32 1, %s1333_s14   ;;  %s1068_s8 = sshll.u32 %s1349_s18, 4 }
  0x17   : > { %s1462_s6 = scalar_select %p38_p11, %s1333_s14, %s40_s24  }
  0x18   : > { %s1067_s7 = sshll.u32 %s153_s5, 6  ;;  %s162_s9 = sadd.s32 %s1345_s17, %s1068_s8 }
  0x19   : > { %s157_s10 = scalar_lea.vmem [#allocation3], %s1067_s7  ;;  %s1069_s20 = sshll.u32 %s162_s9, 7 }
  0x1a   : > { %s165_s11 = sshll.u32 %s157_s10, 4  ;;  %s1471_s25 = scalar_lea.hbm %s1862_s0, %s1069_s20  ;;  %s1466_s11 = int_to_ptr.vmem [resolvable:$true] %s165_s11 }
  0x1b   : > { %p1475_p0 = pnand %p1114_p13, %p1437_p3  ;;  %s1479_s29 = scalar_lea.sflag [#allocation4], %s153_s5 }
  0x1c   : > { %s1225_s30 = scalar_lea.hbm %s1471_s25, 1024  ;;  %s1230_s7 = scalar_lea.hbm %s1862_s0, 4096 }
  0x1d   : > { %p1226_p1 = scmp.ne.s32.totalorder %s1471_s25, %s1225_s30  ;;  %p1227_p2 = pneg %p1475_p0 }
  0x1e   : > { %p1231_p3 = scmp.lt.u32.totalorder %s1471_s25, %s1862_s0  ;;  %p1232_p6 = scmp.lt.u32.totalorder %s1230_s7, %s1225_s30 }
  0x1f   : > { %p1228_p4 = pnand %p1227_p2, %p1226_p1  ;;  %p1234_p10 = scmp.lt.u32.totalorder %s1225_s30, %s1471_s25 }
  0x20   : > { %p1233_p7 = por %p1232_p6, %p1231_p3 }
  0x21   : > { %p1229_p5 = pneg %p1228_p4 }
  0x22   : > { %p1235_p11 = por %p1234_p10, %p1233_p7 }
  0x24   : > { %p1236_p13 = pnand %p1235_p11, %p1229_p5 }
  0x26   : > { %1239 = shalt.err (!%p1236_p13)
}
  0x27   : > { %s1240_s5 = scalar_lea.vmem %s1466_s11, 1024  ;;  %s1355_s10 = smov [#allocation3]  }
  0x28   : > { %p1241_p1 = scmp.ne.s32.totalorder %s1466_s11, %s1240_s5  ;;  %s1245_s20 = sshll.u32 %s1355_s10, 4  ;;  %s1246_s20 = int_to_ptr.vmem [resolvable:$false] %s1245_s20 }
  0x29   : > { %s1247_s21 = scalar_lea.vmem %s1246_s20, 2048  ;;  %p1248_p9 = scmp.lt.s32.totalorder %s1466_s11, %s1246_s20 }
  0x2a   : > { %p1243_p4 = pnand %p1241_p1, %p1227_p2  ;;  %p1249_p3 = scmp.lt.s32.totalorder %s1247_s21, %s1240_s5 }
  0x2c   : > { %p1244_p12 = pneg %p1243_p4  ;;  %p1250_p6 = por %p1249_p3, %p1248_p9 }
  0x2e   : > { %p1251_p7 = pnand %p1250_p6, %p1244_p12 }
  0x30   : > { %1254 = shalt.err (!%p1251_p7)
}
  0x31   : > { %s1356_s30 = smov 256   ;;  %s1357_s23 = smov 128  }
  0x32   : > { %s1358_s26 = smov 8   ;;  %p1070_p2 = scmp.ge.s32.totalorder %s1353_s19, 1 }
  0x33   : > { %1109 = dma.hbm_to_vmem [thread:$0]  (!%p1475_p0), %s1471_s25, 1024, %s1466_s11, %s1479_s29, %s1356_s30, %s1357_s23, %s1358_s26  }
  0x34   : > { %p173_p5 = scmp.lt.s32.totalorder %s1353_s19, 5 }
  0x36   : > { %p174_p10 = pnand %p1070_p2, %p173_p5 }
  0x37   : > { %s1510_s7 = sand.u32 (!%p174_p10), 1, %s1329_s13  }
  0x38   : > { %177 = sbr.rel (%p174_p10) target bundleno = 1270 (0x4f6), region = 32  ;;  %s1071_s8 = sshll.u32 (!%p174_p10), %s1510_s7, 6 }
  0x39   : > { %s180_s9 = scalar_lea.sflag (!%p174_p10), [#allocation4], %s1510_s7  ;;  %s1516_s5 = scalar_lea.vmem (!%p174_p10), [#allocation3], %s1071_s8 }
  0x3f   : > { %1316 = dma.done.wait (%p1445_p8), %s180_s9, 1024  }
  0x40   : > { %1318 = vsyncadd (%p1445_p8), %s180_s9, 4294966272  ;;  %v1359_v0 = vmov 0   ;;  %v1527_v1 = vld [vmem:[%s1516_s5] sm:$0xff]  ;;  %v1530_v2 = vld [vmem:[%s1516_s5 + $0x8] sm:$0xff]  ;;  %s1783_s10 = scalar_lea.vmem [#allocation6], %s1071_s8  ;;  %s1098_s8 = sshll.u32 %s1341_s16, 4 }
  0x41   : > { %299 = vmatprep.subr.bf16.mxu1 %v1359_v0  ;;  %1187 = vset.pattern.permute.xlu0 %v1359_v0  ;;  %v1533_v3 = vld [vmem:[%s1516_s5 + $0x10] sm:$0xff]  ;;  %v1537_v4 = vpack.c.bf16 %v1530_v2, %v1527_v1  ;;  %v1540_v5 = vld [vmem:[%s1516_s5 + $0x18] sm:$0xff]  ;;  %v1548_v7 = vld [vmem:[%s1516_s5 + $0x20] sm:$0xff]  ;;  %s972_s20 = sadd.s32 %s1337_s15, %s1098_s8  ;;  %s975_s21 = sshll.u32 %s1783_s10, 4  ;;  %s1799_s21 = int_to_ptr.vmem [resolvable:$true] %s975_s21 }
  0x42   : > { %1188 = vset.pattern.permute.xlu1 %v1359_v0  ;;  %557 = vmatprep.subr.bf16.mxu0 %v1359_v0  ;;  %v1545_v6 = vpack.c.bf16 %v1540_v5, %v1533_v3  ;;  %v1191_v8 = vld [vmem:[%s1863_s1 + $0x4] ss:$8 sps:$4 sm:$0xff]   ;;  %v257_v11 = vld [vmem:[%s1864_s2 + $0x10] sm:$0xff]  ;;  %v258_v14 = vld [vmem:[%s1864_s2 + $0x18] sm:$0xff]  ;;  %s1099_s16 = sshll.u32 %s972_s20, 7  ;;  %s961_s26 = scalar_lea.sflag [#allocation5], %s1510_s7 }
  0x43   : > { %300 = vmatpush1.bf16.msra.mxu1 %v1537_v4  ;;  %558 = vmatpush1.bf16.msra.mxu0 %v1537_v4  ;;  %v1556_v9 = vld [vmem:[%s1516_s5 + $0x28] sm:$0xff]  ;;  %v255_v10 = vld [vmem:[%s1864_s2] sm:$0xff]  ;;  %v1579_v15 = vld [vmem:[%s1516_s5 + $0x30] sm:$0xff]  ;;  %s1805_s23 = scalar_lea.hbm %s1865_s3, %s1099_s16  ;;  %s1255_s9 = scalar_lea.vmem %s1799_s21, 1024 }
  0x44   : > { %301 = vmatprep.subr.bf16.mxu1 %v1359_v0  ;;  %559 = vmatprep.subr.bf16.mxu0 %v1359_v0  ;;  %v1568_v12 = vpack.c.bf16 %v1556_v9, %v1548_v7  ;;  %v256_v13 = vld [vmem:[%s1864_s2 + $0x8] sm:$0xff]  ;;  %v1582_v16 = vld [vmem:[%s1516_s5 + $0x38] sm:$0xff]  ;;  %v384_v18 = vld [vmem:[%s1864_s2 + $0x20] sm:$0xff]  ;;  %p1256_p8 = scmp.ne.s32.totalorder %s1799_s21, %s1255_s9  ;;  %p1874_p9 = scmp.ne.s32.totalorder %s1871_s28, 0 }
  0x45   : > { %331 = vmatprep.mubr.bf16.mxu1 %v1191_v8  ;;  %261 = vperm.xlu0 %1187, %v255_v10   ;;  %v1588_v17 = vpack.c.bf16 %v1582_v16, %v1579_v15  ;;  %v385_v19 = vld [vmem:[%s1864_s2 + $0x28] sm:$0xff]  ;;  %v1192_v21 = vld [vmem:[%s1863_s1 + $0x14] ss:$8 sps:$4 sm:$0xff]   ;;  %v513_v24 = vld [vmem:[%s1864_s2 + $0x40] sm:$0xff]  ;;  %s1360_s27 = smov [#allocation6]  }
  0x46   : > { %271 = vperm.xlu1 %1188, %v257_v11   ;;  %v1189_v20 = vld [vmem:[%s1863_s1] ss:$8 sps:$4 sm:$0xff]   ;;  %v386_v22 = vld [vmem:[%s1864_s2 + $0x30] sm:$0xff]  ;;  %v387_v23 = vld [vmem:[%s1864_s2 + $0x38] sm:$0xff]  ;;  %p1257_p12 = pnand %p1256_p8, %p1874_p9  ;;  %s1259_s11 = sshll.u32 %s1360_s27, 4  ;;  %s1260_s11 = int_to_ptr.vmem [resolvable:$false] %s1259_s11 }
  0x47   : > { %302 = vmatpush1.bf16.msra.mxu1 %v1545_v6  ;;  %560 = vmatpush1.bf16.msra.mxu0 %v1545_v6  ;;  %v514_v25 = vld [vmem:[%s1864_s2 + $0x48] sm:$0xff]  ;;  %v1194_v26 = vld [vmem:[%s1863_s1 + $0x10] ss:$8 sps:$4 sm:$0xff]   ;;  %v642_v29 = vld [vmem:[%s1864_s2 + $0x60] sm:$0xff]  ;;  %s1261_s5 = scalar_lea.vmem %s1260_s11, 2048  ;;  %p1262_p11 = scmp.lt.s32.totalorder %s1799_s21, %s1260_s11 }
  0x48   : > { %303 = vmatprep.subr.bf16.mxu1 %v1359_v0  ;;  %561 = vmatprep.subr.bf16.mxu0 %v1359_v0  ;;  %v515_v27 = vld [vmem:[%s1864_s2 + $0x50] sm:$0xff]  ;;  %v516_v28 = vld [vmem:[%s1864_s2 + $0x58] sm:$0xff]  ;;  %v643_v30 = vld [vmem:[%s1864_s2 + $0x68] sm:$0xff]  ;;  %p1258_p0 = pneg %p1257_p12  ;;  %p1263_p13 = scmp.lt.s32.totalorder %s1261_s5, %s1255_s9 }
  0x49   : > { %266 = vperm.xlu0 %1187, %v256_v13   ;;  %v644_v31 = vld [vmem:[%s1864_s2 + $0x70] sm:$0xff]  ;;  %v645_v32 = vld [vmem:[%s1864_s2 + $0x78] sm:$0xff]  ;;  %v775_v33 = vld [vmem:[%s1864_s2 + $0x80] sm:$0xff] }
  0x4a   : > { %276 = vperm.xlu1 %1188, %v258_v14   ;;  %v776_v34 = vld [vmem:[%s1864_s2 + $0x88] sm:$0xff]  ;;  %v777_v35 = vld [vmem:[%s1864_s2 + $0x90] sm:$0xff]  ;;  %v778_v36 = vld [vmem:[%s1864_s2 + $0x98] sm:$0xff]  ;;  %p1264_p1 = por %p1263_p13, %p1262_p11 }
  0x4b   : > { %304 = vmatpush1.bf16.msra.mxu1 %v1568_v12  ;;  %562 = vmatpush1.bf16.msra.mxu0 %v1568_v12  ;;  %v779_v37 = vld [vmem:[%s1864_s2 + $0xa0] sm:$0xff]  ;;  %v780_v38 = vld [vmem:[%s1864_s2 + $0xa8] sm:$0xff]  ;;  %v781_v39 = vld [vmem:[%s1864_s2 + $0xb0] sm:$0xff] }
  0x4c   : > { %305 = vmatprep.subr.bf16.mxu1 %v1359_v0  ;;  %563 = vmatprep.subr.bf16.mxu0 %v1359_v0  ;;  %v782_v40 = vld [vmem:[%s1864_s2 + $0xb8] sm:$0xff]  ;;  %v1197_v41 = vld [vmem:[%s1863_s1 + $0x24] ss:$8 sps:$4 sm:$0xff]   ;;  %v1195_v14 = vld [vmem:[%s1863_s1 + $0x20] ss:$8 sps:$4 sm:$0xff]   ;;  %p1265_p4 = pnand %p1264_p1, %p1258_p0 }
  0x4d   : > { %390 = vperm.xlu0 %1187, %v384_v18   ;;  %v1198_v18 = vld [vmem:[%s1863_s1 + $0x34] ss:$8 sps:$4 sm:$0xff]  }
  0x4e   : > { %395 = vperm.xlu1 %1188, %v385_v19   ;;  %v1200_v19 = vld [vmem:[%s1863_s1 + $0x30] ss:$8 sps:$4 sm:$0xff]  }
  0x4f   : > { %306 = vmatpush1.bf16.msra.mxu1 %v1588_v17  ;;  %564 = vmatpush1.bf16.msra.mxu0 %v1588_v17 }
  0x50   : > { %428 = vmatprep.subr.bf16.mxu1 %v1359_v0  ;;  %565 = vmatprep.subr.bf16.mxu0 %v1359_v0 }
  0x51   : > { %400 = vperm.xlu0 %1187, %v386_v22  }
  0x52   : > { %332 = vmatmul.mubr.bf16.vlgmr.msra.gmra.mrb[0].mxu1 %v1189_v20  ;;  %405 = vperm.xlu1 %1188, %v387_v23   ;;  %v1203_v20 = vld [vmem:[%s1863_s1 + $0x44] ss:$8 sps:$4 sm:$0xff]  }
  0x53   : > { %339 = vmatprep.mubr.bf16.mxu1 %v1192_v21  ;;  %429 = vmatpush1.bf16.msra.mxu1 %v1537_v4 }
  0x54   : > { %430 = vmatprep.subr.bf16.mxu1 %v1359_v0  ;;  %589 = vmatprep.mubr.bf16.mxu0 %v1203_v20 }
  0x55   : > { %519 = vperm.xlu0 %1187, %v513_v24  }
  0x56   : > { %524 = vperm.xlu1 %1188, %v514_v25  }
  0x57   : > { %431 = vmatpush1.bf16.msra.mxu1 %v1545_v6 }
  0x58   : > { %432 = vmatprep.subr.bf16.mxu1 %v1359_v0 }
  0x59   : > { %529 = vperm.xlu0 %1187, %v515_v27  }
  0x5a   : > { %340 = vmatmul.mubr.bf16.gmra.mrb[4].mxu1 %v1194_v26  ;;  %534 = vperm.xlu1 %1188, %v516_v28  }
  0x5b   : > { %433 = vmatpush1.bf16.msra.mxu1 %v1568_v12  ;;  %460 = vmatprep.mubr.bf16.mxu1 %v1197_v41 }
  0x5c   : > { %434 = vmatprep.subr.bf16.mxu1 %v1359_v0 }
  0x5d   : > { %648 = vperm.xlu0 %1187, %v642_v29  }
  0x5e   : > { %653 = vperm.xlu1 %1188, %v643_v30  }
  0x5f   : > { %435 = vmatpush1.bf16.msra.mxu1 %v1588_v17 }
  0x60   : > { %436 = vmatprep.subr.bf16.mxu1 %v1359_v0 }
  0x61   : > { %658 = vperm.xlu0 %1187, %v644_v31  }
  0x62   : > { %663 = vperm.xlu1 %1188, %v645_v32  }
  0x65   : > { %785 = vperm.xlu0 %1187, %v775_v33  }
  0x66   : > { %790 = vperm.xlu1 %1188, %v776_v34  }
  0x69   : > { %795 = vperm.xlu0 %1187, %v777_v35  }
  0x6a   : > { %800 = vperm.xlu1 %1188, %v778_v36  }
  0x6d   : > { %805 = vperm.xlu0 %1187, %v779_v37  }
  0x6e   : > { %810 = vperm.xlu1 %1188, %v780_v38  }
  0x71   : > { %815 = vperm.xlu0 %1187, %v781_v39  }
  0x72   : > { %820 = vperm.xlu1 %1188, %v782_v40  }
  0xc4   : > { %v262_v42 = vpop.permute.xlu0 %261 }
  0xc5   : > { %v272_v51 = vpop.permute.xlu1 %271 }
  0xc8   : > { %v267_v46 = vpop.permute.xlu0 %266 }
  0xc9   : > { %v277_v59 = vpop.permute.xlu1 %276 }
  0xcc   : > { %v391_v21 = vpop.permute.xlu0 %390 }
  0xcd   : > { %v396_v25 = vpop.permute.xlu1 %395 }
  0xd0   : > { %v401_v33 = vpop.permute.xlu0 %400 }
  0xd1   : > { %v406_v38 = vpop.permute.xlu1 %405 }
 0x125   : > { %v333_v43 = vpop.f32.mrb[0].mxu1 }
 0x126   : > { %v334_v44 = vadd.f32 %v333_v43, %v262_v42  ;;  %v335_v45 = vpop.f32.mrb[1].mxu1 }
 0x127   : > { %v336_v47 = vpop.f32.mrb[2].mxu1 }
 0x128   : > { %v352_v48 = vmul.f32 0.2, %v334_v44  ;;  %v337_v49 = vadd.f32 %v336_v47, %v267_v46  ;;  %v338_v50 = vpop.f32.mrb[3].mxu1  ;;  %vm348_vm0 = vcmp.ge.f32.partialorder %v334_v44, 0.0  ;;  %v1201_v47 = vld [vmem:[%s1863_s1 + $0x40] ss:$8 sps:$4 sm:$0xff]  }
 0x12a   : > { %vm349_vm1 = vcmp.ge.f32.partialorder %v337_v49, 0.0  ;;  %v353_v52 = vmul.f32 0.2, %v337_v49  ;;  %v356_v53 = vsel %vm348_vm0, %v334_v44, %v352_v48  ;;  %v1204_v48 = vld [vmem:[%s1863_s1 + $0x54] ss:$8 sps:$4 sm:$0xff]  }
 0x12c   : > { %v357_v54 = vsel %vm349_vm1, %v337_v49, %v353_v52  ;;  %v1206_v49 = vld [vmem:[%s1863_s1 + $0x50] ss:$8 sps:$4 sm:$0xff]  }
 0x12d   : > { %v1677_v55 = vpack.c.bf16 %v357_v54, %v356_v53  ;;  %v341_v56 = vpop.f32.mrb[4].mxu1 }
 0x12e   : > { %v342_v57 = vadd.f32 %v341_v56, %v272_v51  ;;  %v343_v58 = vpop.f32.mrb[5].mxu1  ;;  %v525_v51 = vpop.permute.xlu1 %524 }
 0x12f   : > { %v344_v60 = vpop.f32.mrb[6].mxu1  ;;  %437 = vmatpush1.bf16.msra.mxu1 %v1677_v55  ;;  %566 = vmatpush1.bf16.msra.mxu0 %v1677_v55 }
 0x130   : > { %v354_v61 = vmul.f32 0.2, %v342_v57  ;;  %v345_v62 = vadd.f32 %v344_v60, %v277_v59  ;;  %v346_v63 = vpop.f32.mrb[7].mxu1  ;;  %438 = vmatprep.subr.bf16.mxu1 %v1359_v0  ;;  %567 = vmatprep.subr.bf16.mxu0 %v1359_v0  ;;  %vm350_vm2 = vcmp.ge.f32.partialorder %v342_v57, 0.0 }
 0x132   : > { %vm351_vm3 = vcmp.ge.f32.partialorder %v345_v62, 0.0  ;;  %v355_v8 = vmul.f32 0.2, %v345_v62  ;;  %v358_v10 = vsel %vm350_vm2, %v342_v57, %v354_v61 }
 0x134   : > { %v359_v11 = vsel %vm351_vm3, %v345_v62, %v355_v8  ;;  %v535_v8 = vpop.permute.xlu1 %534 }
 0x135   : > { %v1683_v13 = vpack.c.bf16 %v359_v11, %v358_v10 }
 0x137   : > { %439 = vmatpush1.bf16.msra.mxu1 %v1683_v13  ;;  %568 = vmatpush1.bf16.msra.mxu0 %v1683_v13 }
 0x138   : > { %686 = vmatprep.subr.bf16.mxu1 %v1359_v0  ;;  %569 = vmatprep.subr.bf16.mxu0 %v1359_v0 }
 0x13a   : > { %461 = vmatmul.mubr.bf16.vlgmr.msra.gmra.mrb[8].mxu1 %v1195_v14 }
 0x13b   : > { %687 = vmatpush1.bf16.msra.mxu1 %v1537_v4  ;;  %468 = vmatprep.mubr.bf16.mxu1 %v1198_v18 }
 0x13c   : > { %688 = vmatprep.subr.bf16.mxu1 %v1359_v0 }
 0x13f   : > { %689 = vmatpush1.bf16.msra.mxu1 %v1545_v6 }
 0x140   : > { %690 = vmatprep.subr.bf16.mxu1 %v1359_v0 }
 0x142   : > { %469 = vmatmul.mubr.bf16.gmra.mrb[12].mxu1 %v1200_v19 }
 0x143   : > { %691 = vmatpush1.bf16.msra.mxu1 %v1568_v12 }
 0x144   : > { %692 = vmatprep.subr.bf16.mxu1 %v1359_v0 }
 0x147   : > { %693 = vmatpush1.bf16.msra.mxu1 %v1588_v17 }
 0x148   : > { %694 = vmatprep.subr.bf16.mxu1 %v1359_v0 }
 0x14b   : > { %695 = vmatpush1.bf16.msra.mxu1 %v1677_v55 }
 0x14c   : > { %696 = vmatprep.subr.bf16.mxu1 %v1359_v0 }
 0x14f   : > { %697 = vmatpush1.bf16.msra.mxu1 %v1683_v13 }
 0x150   : > { %698 = vmatprep.subr.bf16.mxu1 %v1359_v0 }
 0x20d   : > { %v462_v22 = vpop.f32.mrb[8].mxu1 }
 0x20e   : > { %v463_v23 = vadd.f32 %v462_v22, %v391_v21  ;;  %v464_v24 = vpop.f32.mrb[9].mxu1  ;;  %v1207_v22 = vld [vmem:[%s1863_s1 + $0x60] ss:$8 sps:$4 sm:$0xff]  }
 0x20f   : > { %v465_v26 = vpop.f32.mrb[10].mxu1  ;;  %v1212_v24 = vld [vmem:[%s1863_s1 + $0x70] ss:$8 sps:$4 sm:$0xff]  }
 0x210   : > { %v481_v27 = vmul.f32 0.2, %v463_v23  ;;  %v466_v28 = vadd.f32 %v465_v26, %v396_v25  ;;  %v467_v29 = vpop.f32.mrb[11].mxu1  ;;  %vm477_vm4 = vcmp.ge.f32.partialorder %v463_v23, 0.0  ;;  %v1215_v25 = vld [vmem:[%s1863_s1 + $0x84] ss:$8 sps:$4 sm:$0xff]  }
 0x212   : > { %vm478_vm5 = vcmp.ge.f32.partialorder %v466_v28, 0.0  ;;  %v482_v30 = vmul.f32 0.2, %v466_v28  ;;  %v485_v31 = vsel %vm477_vm4, %v463_v23, %v481_v27  ;;  %v1210_v23 = vld [vmem:[%s1863_s1 + $0x74] ss:$8 sps:$4 sm:$0xff]  }
 0x214   : > { %v486_v32 = vsel %vm478_vm5, %v466_v28, %v482_v30  ;;  %v654_v30 = vpop.permute.xlu1 %653 }
 0x215   : > { %v470_v34 = vpop.f32.mrb[12].mxu1  ;;  %v489_v35 = vpack.c.bf16 %v486_v32, %v485_v31 }
 0x216   : > { %v471_v36 = vadd.f32 %v470_v34, %v401_v33  ;;  %v472_v37 = vpop.f32.mrb[13].mxu1 }
 0x217   : > { %v473_v39 = vpop.f32.mrb[14].mxu1  ;;  %570 = vmatpush1.bf16.msra.mxu0 %v489_v35  ;;  %699 = vmatpush1.bf16.msra.mxu1 %v489_v35 }
 0x218   : > { %v483_v40 = vmul.f32 0.2, %v471_v36  ;;  %v474_v41 = vadd.f32 %v473_v39, %v406_v38  ;;  %v475_v42 = vpop.f32.mrb[15].mxu1  ;;  %571 = vmatprep.subr.bf16.mxu0 %v1359_v0  ;;  %700 = vmatprep.subr.bf16.mxu1 %v1359_v0  ;;  %vm479_vm6 = vcmp.ge.f32.partialorder %v471_v36, 0.0 }
 0x21a   : > { %vm480_vm7 = vcmp.ge.f32.partialorder %v474_v41, 0.0  ;;  %v484_v43 = vmul.f32 0.2, %v474_v41  ;;  %v487_v44 = vsel %vm479_vm6, %v471_v36, %v483_v40 }
 0x21c   : > { %v488_v45 = vsel %vm480_vm7, %v474_v41, %v484_v43  ;;  %v664_v43 = vpop.permute.xlu1 %663 }
 0x21d   : > { %v490_v46 = vpack.c.bf16 %v488_v45, %v487_v44 }
 0x21f   : > { %572 = vmatpush1.bf16.msra.mxu0 %v490_v46  ;;  %701 = vmatpush1.bf16.msra.mxu1 %v490_v46 }
 0x220   : > { %863 = vmatprep.subr.bf16.mxu0 %v1359_v0  ;;  %702 = vmatprep.subr.bf16.mxu1 %v1359_v0 }
 0x222   : > { %590 = vmatmul.mubr.bf16.vlgmr.msra.gmra.mrb[0].mxu0 %v1201_v47 }
 0x223   : > { %864 = vmatpush1.bf16.msra.mxu0 %v1537_v4  ;;  %597 = vmatprep.mubr.bf16.mxu0 %v1204_v48  ;;  %v1209_v4 = vld [vmem:[%s1863_s1 + $0x64] ss:$8 sps:$4 sm:$0xff]  }
 0x224   : > { %865 = vmatprep.subr.bf16.mxu0 %v1359_v0  ;;  %718 = vmatprep.mubr.bf16.mxu1 %v1209_v4 }
 0x227   : > { %866 = vmatpush1.bf16.msra.mxu0 %v1545_v6  ;;  %v520_v6 = vpop.permute.xlu0 %519 }
 0x228   : > { %867 = vmatprep.subr.bf16.mxu0 %v1359_v0 }
 0x22a   : > { %598 = vmatmul.mubr.bf16.gmra.mrb[4].mxu0 %v1206_v49 }
 0x22b   : > { %868 = vmatpush1.bf16.msra.mxu0 %v1568_v12  ;;  %v530_v59 = vpop.permute.xlu0 %529  ;;  %895 = vmatprep.mubr.bf16.mxu0 %v1215_v25 }
 0x22c   : > { %869 = vmatprep.subr.bf16.mxu0 %v1359_v0 }
 0x22f   : > { %870 = vmatpush1.bf16.msra.mxu0 %v1588_v17  ;;  %v649_v26 = vpop.permute.xlu0 %648 }
 0x230   : > { %871 = vmatprep.subr.bf16.mxu0 %v1359_v0 }
 0x233   : > { %872 = vmatpush1.bf16.msra.mxu0 %v1677_v55  ;;  %v659_v38 = vpop.permute.xlu0 %658 }
 0x234   : > { %873 = vmatprep.subr.bf16.mxu0 %v1359_v0 }
 0x237   : > { %874 = vmatpush1.bf16.msra.mxu0 %v1683_v13 }
 0x238   : > { %875 = vmatprep.subr.bf16.mxu0 %v1359_v0 }
 0x23b   : > { %876 = vmatpush1.bf16.msra.mxu0 %v489_v35 }
 0x23c   : > { %877 = vmatprep.subr.bf16.mxu0 %v1359_v0 }
 0x23f   : > { %878 = vmatpush1.bf16.msra.mxu0 %v490_v46 }
 0x240   : > { %879 = vmatprep.subr.bf16.mxu0 %v1359_v0 }
 0x2f5   : > { %v591_v12 = vpop.f32.mrb[0].mxu0 }
 0x2f6   : > { %v592_v17 = vadd.f32 %v591_v12, %v520_v6  ;;  %v593_v50 = vpop.f32.mrb[1].mxu0  ;;  %v1213_v12 = vld [vmem:[%s1863_s1 + $0x80] ss:$8 sps:$4 sm:$0xff]  }
 0x2f7   : > { %v594_v52 = vpop.f32.mrb[2].mxu0  ;;  %v1219_v50 = vld [vmem:[%s1863_s1 + $0xa4] ss:$8 sps:$4 sm:$0xff]  }
 0x2f8   : > { %v610_v53 = vmul.f32 0.2, %v592_v17  ;;  %v595_v54 = vadd.f32 %v594_v52, %v525_v51  ;;  %v596_v55 = vpop.f32.mrb[3].mxu0  ;;  %vm606_vm8 = vcmp.ge.f32.partialorder %v592_v17, 0.0  ;;  %v1221_v51 = vld [vmem:[%s1863_s1 + $0xa0] ss:$8 sps:$4 sm:$0xff]  }
 0x2f9   : > { %v1222_v52 = vld [vmem:[%s1863_s1 + $0xb4] ss:$8 sps:$4 sm:$0xff]  }
 0x2fa   : > { %vm607_vm9 = vcmp.ge.f32.partialorder %v595_v54, 0.0  ;;  %v611_v56 = vmul.f32 0.2, %v595_v54  ;;  %v614_v57 = vsel %vm606_vm8, %v592_v17, %v610_v53  ;;  %v1216_v17 = vld [vmem:[%s1863_s1 + $0x94] ss:$8 sps:$4 sm:$0xff]  }
 0x2fb   : > { %v1224_v53 = vld [vmem:[%s1863_s1 + $0xb0] ss:$8 sps:$4 sm:$0xff]  }
 0x2fc   : > { %v615_v58 = vsel %vm607_vm9, %v595_v54, %v611_v56  ;;  %v786_v54 = vpop.permute.xlu0 %785 }
 0x2fd   : > { %v618_v60 = vpack.c.bf16 %v615_v58, %v614_v57  ;;  %v599_v61 = vpop.f32.mrb[4].mxu0  ;;  %v791_v58 = vpop.permute.xlu1 %790 }
 0x2fe   : > { %v600_v62 = vadd.f32 %v599_v61, %v530_v59  ;;  %v601_v63 = vpop.f32.mrb[5].mxu0 }
 0x2ff   : > { %v602_v10 = vpop.f32.mrb[6].mxu0  ;;  %703 = vmatpush1.bf16.msra.mxu1 %v618_v60  ;;  %880 = vmatpush1.bf16.msra.mxu0 %v618_v60 }
 0x300   : > { %v612_v11 = vmul.f32 0.2, %v600_v62  ;;  %v603_v13 = vadd.f32 %v602_v10, %v535_v8  ;;  %v604_v14 = vpop.f32.mrb[7].mxu0  ;;  %704 = vmatprep.subr.bf16.mxu1 %v1359_v0  ;;  %881 = vmatprep.subr.bf16.mxu0 %v1359_v0  ;;  %vm608_vm10 = vcmp.ge.f32.partialorder %v600_v62, 0.0 }
 0x302   : > { %vm609_vm11 = vcmp.ge.f32.partialorder %v603_v13, 0.0  ;;  %v613_v18 = vmul.f32 0.2, %v603_v13  ;;  %v616_v19 = vsel %vm608_vm10, %v600_v62, %v612_v11  ;;  %v796_v11 = vpop.permute.xlu0 %795 }
 0x304   : > { %v617_v20 = vsel %vm609_vm11, %v603_v13, %v613_v18 }
 0x305   : > { %v619_v21 = vpack.c.bf16 %v617_v20, %v616_v19  ;;  %v801_v19 = vpop.permute.xlu1 %800 }
 0x307   : > { %705 = vmatpush1.bf16.msra.mxu1 %v619_v21  ;;  %882 = vmatpush1.bf16.msra.mxu0 %v619_v21 }
 0x308   : > { %883 = vmatprep.subr.bf16.mxu0 %v1359_v0 }
 0x30a   : > { %719 = vmatmul.mubr.bf16.vlgmr.msra.gmra.mrb[16].mxu1 %v1207_v22 }
 0x30b   : > { %726 = vmatprep.mubr.bf16.mxu1 %v1210_v23 }
 0x312   : > { %727 = vmatmul.mubr.bf16.gmra.mrb[20].mxu1 %v1212_v24 }
 0x3dd   : > { %v720_v27 = vpop.f32.mrb[16].mxu1 }
 0x3de   : > { %v721_v28 = vadd.f32 %v720_v27, %v649_v26  ;;  %v722_v29 = vpop.f32.mrb[17].mxu1 }
 0x3df   : > { %v723_v31 = vpop.f32.mrb[18].mxu1  ;;  %v811_v29 = vpop.permute.xlu1 %810 }
 0x3e0   : > { %v739_v32 = vmul.f32 0.2, %v721_v28  ;;  %v724_v33 = vadd.f32 %v723_v31, %v654_v30  ;;  %v725_v34 = vpop.f32.mrb[19].mxu1  ;;  %vm735_vm12 = vcmp.ge.f32.partialorder %v721_v28, 0.0 }
 0x3e2   : > { %vm736_vm13 = vcmp.ge.f32.partialorder %v724_v33, 0.0  ;;  %v740_v35 = vmul.f32 0.2, %v724_v33  ;;  %v743_v36 = vsel %vm735_vm12, %v721_v28, %v739_v32 }
 0x3e4   : > { %v744_v37 = vsel %vm736_vm13, %v724_v33, %v740_v35 }
 0x3e5   : > { %v747_v39 = vpack.c.bf16 %v744_v37, %v743_v36  ;;  %v728_v40 = vpop.f32.mrb[20].mxu1 }
 0x3e6   : > { %v729_v41 = vadd.f32 %v728_v40, %v659_v38  ;;  %v730_v42 = vpop.f32.mrb[21].mxu1 }
 0x3e7   : > { %v731_v44 = vpop.f32.mrb[22].mxu1  ;;  %884 = vmatpush1.bf16.msra.mxu0 %v747_v39  ;;  %v821_v39 = vpop.permute.xlu1 %820 }
 0x3e8   : > { %v741_v45 = vmul.f32 0.2, %v729_v41  ;;  %v732_v46 = vadd.f32 %v731_v44, %v664_v43  ;;  %v733_v47 = vpop.f32.mrb[23].mxu1  ;;  %885 = vmatprep.subr.bf16.mxu0 %v1359_v0  ;;  %vm737_vm14 = vcmp.ge.f32.partialorder %v729_v41, 0.0  ;;  %v1218_v0 = vld [vmem:[%s1863_s1 + $0x90] ss:$8 sps:$4 sm:$0xff]  }
 0x3ea   : > { %vm738_vm15 = vcmp.ge.f32.partialorder %v732_v46, 0.0  ;;  %v742_v48 = vmul.f32 0.2, %v732_v46  ;;  %v745_v49 = vsel %vm737_vm14, %v729_v41, %v741_v45 }
 0x3ec   : > { %v746_v4 = vsel %vm738_vm15, %v732_v46, %v742_v48 }
 0x3ed   : > { %v748_v6 = vpack.c.bf16 %v746_v4, %v745_v49 }
 0x3ef   : > { %886 = vmatpush1.bf16.msra.mxu0 %v748_v6 }
 0x3f2   : > { %896 = vmatmul.mubr.bf16.vlgmr.msra.gmra.mrb[8].mxu0 %v1213_v12 }
 0x3f3   : > { %903 = vmatprep.mubr.bf16.mxu0 %v1216_v17 }
 0x3fa   : > { %904 = vmatmul.mubr.bf16.gmra.mrb[12].mxu0 %v1218_v0 }
 0x3fb   : > { %911 = vmatprep.mubr.bf16.mxu0 %v1219_v50 }
 0x402   : > { %912 = vmatmul.mubr.bf16.gmra.mrb[16].mxu0 %v1221_v51 }
 0x403   : > { %919 = vmatprep.mubr.bf16.mxu0 %v1222_v52 }
 0x40a   : > { %920 = vmatmul.mubr.bf16.gmra.mrb[20].mxu0 %v1224_v53 }
 0x4c5   : > { %v897_v55 = vpop.f32.mrb[8].mxu0 }
 0x4c6   : > { %v898_v56 = vadd.f32 %v897_v55, %v786_v54  ;;  %v899_v57 = vpop.f32.mrb[9].mxu0 }
 0x4c7   : > { %v900_v59 = vpop.f32.mrb[10].mxu0 }
 0x4c8   : > { %v928_v60 = vmul.f32 0.2, %v898_v56  ;;  %v901_v61 = vadd.f32 %v900_v59, %v791_v58  ;;  %v902_v62 = vpop.f32.mrb[11].mxu0 }
 0x4ca   : > { %v944_v63 = vadd.f32 %v928_v60, %v1527_v1  ;;  %v929_v8 = vmul.f32 0.2, %v901_v61 }
 0x4cc   : > { %952 = vst [vmem:[%s1783_s10] sm:$0xff] %v944_v63  ;;  %v945_v10 = vadd.f32 %v929_v8, %v1530_v2  ;;  %v806_v2 = vpop.permute.xlu0 %805 }
 0x4cd   : > { %v905_v13 = vpop.f32.mrb[12].mxu0 }
 0x4ce   : > { %953 = vst [vmem:[%s1783_s10 + $0x8] sm:$0xff] %v945_v10  ;;  %v906_v14 = vadd.f32 %v905_v13, %v796_v11  ;;  %v907_v18 = vpop.f32.mrb[13].mxu0 }
 0x4cf   : > { %v908_v20 = vpop.f32.mrb[14].mxu0 }
 0x4d0   : > { %v930_v21 = vmul.f32 0.2, %v906_v14  ;;  %v909_v1 = vadd.f32 %v908_v20, %v801_v19  ;;  %v910_v22 = vpop.f32.mrb[15].mxu0  ;;  %v816_v35 = vpop.permute.xlu0 %815 }
 0x4d2   : > { %v946_v23 = vadd.f32 %v930_v21, %v1533_v3  ;;  %v931_v24 = vmul.f32 0.2, %v909_v1 }
 0x4d4   : > { %954 = vst [vmem:[%s1783_s10 + $0x10] sm:$0xff] %v946_v23  ;;  %v947_v25 = vadd.f32 %v931_v24, %v1540_v5 }
 0x4d5   : > { %v913_v26 = vpop.f32.mrb[16].mxu0 }
 0x4d6   : > { %955 = vst [vmem:[%s1783_s10 + $0x18] sm:$0xff] %v947_v25  ;;  %v914_v27 = vadd.f32 %v913_v26, %v806_v2  ;;  %v915_v28 = vpop.f32.mrb[17].mxu0 }
 0x4d7   : > { %v916_v30 = vpop.f32.mrb[18].mxu0 }
 0x4d8   : > { %v932_v31 = vmul.f32 0.2, %v914_v27  ;;  %v917_v32 = vadd.f32 %v916_v30, %v811_v29  ;;  %v918_v33 = vpop.f32.mrb[19].mxu0 }
 0x4da   : > { %v948_v3 = vadd.f32 %v932_v31, %v1548_v7  ;;  %v933_v34 = vmul.f32 0.2, %v917_v32 }
 0x4dc   : > { %956 = vst [vmem:[%s1783_s10 + $0x20] sm:$0xff] %v948_v3  ;;  %v949_v5 = vadd.f32 %v933_v34, %v1556_v9 }
 0x4dd   : > { %v921_v36 = vpop.f32.mrb[20].mxu0 }
 0x4de   : > { %957 = vst [vmem:[%s1783_s10 + $0x28] sm:$0xff] %v949_v5  ;;  %v922_v37 = vadd.f32 %v921_v36, %v816_v35  ;;  %v923_v38 = vpop.f32.mrb[21].mxu0 }
 0x4df   : > { %v924_v40 = vpop.f32.mrb[22].mxu0 }
 0x4e0   : > { %v934_v41 = vmul.f32 0.2, %v922_v37  ;;  %v925_v7 = vadd.f32 %v924_v40, %v821_v39  ;;  %v926_v42 = vpop.f32.mrb[23].mxu0 }
 0x4e2   : > { %v950_v9 = vadd.f32 %v934_v41, %v1579_v15  ;;  %v935_v43 = vmul.f32 0.2, %v925_v7 }
 0x4e4   : > { %958 = vst [vmem:[%s1783_s10 + $0x30] sm:$0xff] %v950_v9  ;;  %v951_v44 = vadd.f32 %v935_v43, %v1582_v16 }
 0x4e6   : > { %959 = vst [vmem:[%s1783_s10 + $0x38] sm:$0xff] %v951_v44 }
 0x4e7   : > { %1268 = shalt.err (!%p1265_p4)
}
 0x4e8   : > { %s1269_s25 = scalar_lea.hbm %s1805_s23, 1024  ;;  %s1273_s10 = scalar_lea.hbm %s1865_s3, 4096 }
 0x4e9   : > { %p1270_p3 = scmp.ne.s32.totalorder %s1805_s23, %s1269_s25  ;;  %p1274_p2 = scmp.lt.u32.totalorder %s1805_s23, %s1865_s3 }
 0x4ea   : > { %p1275_p5 = scmp.lt.u32.totalorder %s1273_s10, %s1269_s25  ;;  %p1277_p8 = scmp.lt.u32.totalorder %s1269_s25, %s1805_s23 }
 0x4eb   : > { %p1271_p6 = pnand %p1270_p3, %p1874_p9 }
 0x4ec   : > { %p1276_p10 = por %p1275_p5, %p1274_p2 }
 0x4ed   : > { %p1272_p7 = pneg %p1271_p6 }
 0x4ee   : > { %p1278_p12 = por %p1277_p8, %p1276_p10 }
 0x4f0   : > { %p1279_p0 = pnand %p1278_p12, %p1272_p7 }
 0x4f2   : > { %1282 = shalt.err (!%p1279_p0)
}
 0x4f3   : > { %s1361_s16 = smov 128   ;;  %s1362_s15 = smov 256  }
 0x4f4   : > { %s1363_s30 = smov 8  }
 0x4f5   : > { %1104 = dma.vmem_to_hbm [thread:$0]  (%p1874_p9), %s1799_s21, 1024, %s1805_s23, %s961_s26, %s1361_s16, %s1362_s15, %s1363_s30  }
 0x4f6 PF: > { %p1115_p11 = scmp.ge.s32.totalorder %s1353_s19, 2  ;;  %s990_s9 = sand.u32 1, %s1325_s12  }
 0x4f7   : > { %p1875_p13 = scmp.ne.s32.totalorder %s1872_s4, 0  ;;  %s991_s27 = scalar_lea.sflag [#allocation5], %s990_s9 }
 0x4f9   : > { %p1111_p1 = pnand %p1115_p11, %p1875_p13 }
 0x4fb   : > { %1320 = dma.done.wait (!%p1111_p1), %s991_s27, 1024  }
 0x4fc   : > { %1322 = vsyncadd (!%p1111_p1), %s991_s27, 4294966272  ;;  %s19_s19 = sadd.s32 1, %s1353_s19   ;;  %s1876_s28 = sld [smem:[#allocation9_spill]] }
 0x4fd   : > { %p16_p4 = scmp.ge.s32.totalorder %s19_s19, 6   ;;  %s1877_s12 = smov %s1329_s13 }
 0x4fe   : > { %s1878_s13 = smov %s1333_s14  ;;  %s1879_s14 = smov %s1462_s6 }
 0x4ff   : > { %s1880_s15 = smov %s1345_s17  ;;  %s1881_s16 = smov %s1349_s18 }
 0x500   : > { %s1882_s17 = smov %s1885_s22  ;;  %18 = sbr.rel (!%p16_p4) target bundleno = 7 (0x7), region = 77 }
 0x502   : > { %s1883_s18 = smov %s1876_s28 }
 0x507   :  { %996 = vsyncpa [#allocation4], 1 }
 0x508   :  { %998 = vsyncpa [#allocation4 + $0x1], 1 }
 0x509   :  { %999 = vsyncpa [#allocation5], 1 }
 0x50a   :  { %1001 = vsyncpa [#allocation5 + $0x1], 1 }

</bundles_post_ra>
